<compile_context>
chip_gen: v5e
topology: v5e:2x2
jax: 0.10.0
libtpu: 0.0.40
codegen_flags: <defaults>
</compile_context>

<pallas_src>
import functools

import jax
import jax.numpy as jnp
from jax.experimental import pallas as pl
from jax.experimental.pallas import tpu as pltpu

_LANE = 128
_SUBLANE = 8


def _round_up(n, m):
    return ((n + m - 1) // m) * m


def _mlp_kernel(x_ref, w1_ref, b1_ref, w2_ref, b2_ref, w3_ref, b3_ref, o_ref,
                *, compute_dtype):
    # Layer 1: (bm, d_in) @ (d_in, 128) in f32 (keeps full input precision; the
    # kernel is DMA-bound so the extra MXU passes are free). Bias + ReLU in f32.
    h1 = jnp.dot(x_ref[...], w1_ref[...], preferred_element_type=jnp.float32)
    h1 = jnp.maximum(h1 + b1_ref[...], 0.0)
    # Layer 2: (bm, 128) @ (128, 128)  (hidden 64 zero-padded to 128 in the weight).
    h2 = jnp.dot(h1.astype(compute_dtype), w2_ref[...],
                 preferred_element_type=jnp.float32)
    h2 = jnp.maximum(h2 + b2_ref[...], 0.0)
    # Layer 3: (bm, 128) @ (128, latent), bias add, store unpadded.
    out = jnp.dot(h2.astype(compute_dtype), w3_ref[...],
                  preferred_element_type=jnp.float32)
    o_ref[...] = (out + b3_ref[...]).astype(o_ref.dtype)


def flame_expression_code_encoder(x, params, *, block_m=2048, use_bf16=True):
    """Fused MLP forward. x: (B, input_size) float32. Returns (B, latent)."""
    w1, b1, w2, b2, w3, b3 = params
    B, d_in = x.shape
    h1_dim = w1.shape[1]          # 128
    h2_dim = w2.shape[1]          # 64
    latent = w3.shape[1]

    compute_dtype = jnp.bfloat16 if use_bf16 else jnp.float32

    # Hidden dims padded to a full 128-lane tile inside the (tiny) weights only.
    # Padding is exact zeros; padded intermediates never touch HBM.
    h1_p = _round_up(h1_dim, _LANE)
    h2_p = _round_up(h2_dim, _LANE)

    w1p = jnp.zeros((d_in, h1_p), x.dtype).at[:, :h1_dim].set(w1.astype(x.dtype))
    b1p = jnp.zeros((1, h1_p), jnp.float32).at[:, :h1_dim].set(
        b1.reshape(1, -1).astype(jnp.float32))
    w2p = jnp.zeros((h1_p, h2_p), compute_dtype).at[:h1_dim, :h2_dim].set(
        w2.astype(compute_dtype))
    b2p = jnp.zeros((1, h2_p), jnp.float32).at[:, :h2_dim].set(
        b2.reshape(1, -1).astype(jnp.float32))
    w3p = jnp.zeros((h2_p, latent), compute_dtype).at[:h2_dim, :].set(
        w3.astype(compute_dtype))
    b3p = b3.reshape(1, -1).astype(jnp.float32)

    # Batch tile: as large as possible (amortize per-step overhead), but
    #  (a) clamped to the sublane-rounded batch,
    #  (b) capped at ceil(B/2) so the grid has >= 2 "parallel" steps and v7x's
    #      two TensorCores both get work (no cost on single-TC v5e/v6e).
    # Ragged last block is handled by Pallas's masked block reads/writes.
    bm = min(block_m,
             _round_up(B, _SUBLANE),
             max(_SUBLANE, _round_up(pl.cdiv(B, 2), _SUBLANE)))
    bm = max(_SUBLANE, _round_up(bm, _SUBLANE))
    grid = (pl.cdiv(B, bm),)

    def full_spec(shape):
        # Grid-invariant full-tensor resident (weights/biases are tiny).
        return pl.BlockSpec(shape, lambda i: (0, 0))

    out = pl.pallas_call(
        functools.partial(_mlp_kernel, compute_dtype=compute_dtype),
        out_shape=jax.ShapeDtypeStruct((B, latent), x.dtype),
        grid_spec=pltpu.PrefetchScalarGridSpec(
            num_scalar_prefetch=0,
            grid=grid,
            in_specs=[
                pl.BlockSpec((bm, d_in), lambda i: (i, 0)),   # raw f32 x rows
                full_spec(w1p.shape), full_spec(b1p.shape),
                full_spec(w2p.shape), full_spec(b2p.shape),
                full_spec(w3p.shape), full_spec(b3p.shape),
            ],
            out_specs=pl.BlockSpec((bm, latent), lambda i: (i, 0)),
        ),
        compiler_params=pltpu.CompilerParams(
            dimension_semantics=("parallel",),
            vmem_limit_bytes=32 * 1024 * 1024,
        ),
    )(x, w1p, b1p, w2p, b2p, w3p, b3p)
    return out


def init_params(key, input_size, latent_size, dtype=jnp.float32):
    """Synthetic init matching nn.Linear shapes.

    PyTorch stores Linear weights as (out, in); we pre-transpose to (in, out)
    so the kernel computes x @ W directly (same math as x @ W_torch.T).
    """
    ks = jax.random.split(key, 6)

    def linear(kw, kb, fan_in, fan_out):
        bound = 1.0 / jnp.sqrt(fan_in)
        w = jax.random.uniform(kw, (fan_in, fan_out), dtype, -bound, bound)
        b = jax.random.uniform(kb, (1, fan_out), dtype, -bound, bound)
        return w, b

    w1, b1 = linear(ks[0], ks[1], input_size, 128)
    w2, b2 = linear(ks[2], ks[3], 128, 64)
    w3, b3 = linear(ks[4], ks[5], 64, latent_size)
    return (w1, b1, w2, b2, w3, b3)


def reference_forward(x, params):
    w1, b1, w2, b2, w3, b3 = params
    hp = jax.lax.Precision.HIGHEST
    h = jnp.maximum(jnp.matmul(x, w1, precision=hp) + b1, 0.0)
    h = jnp.maximum(jnp.matmul(h, w2, precision=hp) + b2, 0.0)
    return jnp.matmul(h, w3, precision=hp) + b3


if __name__ == "__main__":
    input_size = 50    # FLAME expression code dimension
    latent_size = 16
    batch = 8

    key = jax.random.PRNGKey(0)
    kx, kp = jax.random.split(key)
    x = jax.random.normal(kx, (batch, input_size), dtype=jnp.float32)
    params = init_params(kp, input_size, latent_size)
    ref = reference_forward(x, params)

    # 1) f32 correctness check (all three layers in f32).
    run_f32 = jax.jit(functools.partial(
        flame_expression_code_encoder, use_bf16=False))
    out_f32 = jax.block_until_ready(run_f32(x, params))
    assert out_f32.shape == (batch, latent_size)
    assert jnp.allclose(out_f32, ref, atol=1e-3, rtol=1e-3), "f32 mismatch vs reference"

    # 2) Performance config: f32 layer-1, bf16 layers 2/3, f32 accumulation.
    run_bf16 = jax.jit(functools.partial(
        flame_expression_code_encoder, use_bf16=True))
    out_bf16 = jax.block_until_ready(run_bf16(x, params))
    assert out_bf16.shape == (batch, latent_size)
    assert jnp.allclose(out_bf16, ref, atol=5e-2, rtol=5e-2), "bf16 mismatch vs reference"

    # 3) Ragged batch (B=10, not a multiple of the tile) exercises the cdiv grid
    #    with a masked last block and a >=2-step grid (dual-TC path on v7x).
    x2 = jax.random.normal(kx, (10, input_size), dtype=jnp.float32)
    out2 = jax.block_until_ready(run_bf16(x2, params))
    assert out2.shape == (10, latent_size)
    assert jnp.allclose(out2, reference_forward(x2, params),
                        atol=5e-2, rtol=5e-2), "ragged-batch mismatch"

    print("KERNEL_OK")
</pallas_src>

<mosaic_0001>
module attributes {stable_mosaic.version = 11 : i64} {
  func.func @_mlp_kernel(%arg0: i32, %arg1: memref<8x50xf32, #tpu.memory_space<vmem>>, %arg2: memref<50x128xf32, #tpu.memory_space<vmem>>, %arg3: memref<1x128xf32, #tpu.memory_space<vmem>>, %arg4: memref<128x128xf32, #tpu.memory_space<vmem>>, %arg5: memref<1x128xf32, #tpu.memory_space<vmem>>, %arg6: memref<128x16xf32, #tpu.memory_space<vmem>>, %arg7: memref<1x16xf32, #tpu.memory_space<vmem>>, %arg8: memref<8x16xf32, #tpu.memory_space<vmem>>) attributes {dimension_semantics = [#tpu.dimension_semantics<parallel>], iteration_bounds = array<i64: 1>, scalar_prefetch = 0 : i64, scratch_operands = 0 : i64, tpu.core_type = #tpu.core_type<tc>, window_params = [{transform_indices = @transform_0, window_bounds = array<i64: 8, 50>}, {pipeline_mode = #tpu.pipeline_mode<synchronous>, transform_indices = @transform_1, window_bounds = array<i64: 50, 128>}, {pipeline_mode = #tpu.pipeline_mode<synchronous>, transform_indices = @transform_2, window_bounds = array<i64: 1, 128>}, {pipeline_mode = #tpu.pipeline_mode<synchronous>, transform_indices = @transform_3, window_bounds = array<i64: 128, 128>}, {pipeline_mode = #tpu.pipeline_mode<synchronous>, transform_indices = @transform_4, window_bounds = array<i64: 1, 128>}, {pipeline_mode = #tpu.pipeline_mode<synchronous>, transform_indices = @transform_5, window_bounds = array<i64: 128, 16>}, {pipeline_mode = #tpu.pipeline_mode<synchronous>, transform_indices = @transform_6, window_bounds = array<i64: 1, 16>}, {transform_indices = @transform_7, window_bounds = array<i64: 8, 16>}]} {
    %c0 = arith.constant 0 : index
    %c0_0 = arith.constant 0 : index
    %0 = vector.load %arg1[%c0, %c0_0] : memref<8x50xf32, #tpu.memory_space<vmem>>, vector<8x50xf32>
    %c0_1 = arith.constant 0 : index
    %c0_2 = arith.constant 0 : index
    %1 = vector.load %arg2[%c0_1, %c0_2] : memref<50x128xf32, #tpu.memory_space<vmem>>, vector<50x128xf32>
    %cst = arith.constant dense<0.000000e+00> : vector<8x128xf32>
    %2 = tpu.matmul %0, %1, %cst {dimension_numbers = #tpu.dot_dimension_numbers<[1], [0], [0], [1], [0, 0, 1, 1], [], []>} : vector<8x50xf32>, vector<50x128xf32>, vector<8x128xf32> -> vector<8x128xf32>
    %c0_3 = arith.constant 0 : index
    %c0_4 = arith.constant 0 : index
    %3 = vector.load %arg3[%c0_3, %c0_4] : memref<1x128xf32, #tpu.memory_space<vmem>>, vector<1x128xf32>
    %4 = vector.broadcast %3 : vector<1x128xf32> to vector<8x128xf32>
    %5 = arith.addf %2, %4 : vector<8x128xf32>
    %cst_5 = arith.constant 0.000000e+00 : f32
    %6 = vector.broadcast %cst_5 : f32 to vector<8x128xf32>
    %7 = arith.maximumf %5, %6 : vector<8x128xf32>
    %c0_6 = arith.constant 0 : index
    %c0_7 = arith.constant 0 : index
    %8 = vector.load %arg4[%c0_6, %c0_7] : memref<128x128xf32, #tpu.memory_space<vmem>>, vector<128x128xf32>
    %cst_8 = arith.constant dense<0.000000e+00> : vector<8x128xf32>
    %9 = tpu.matmul %7, %8, %cst_8 {dimension_numbers = #tpu.dot_dimension_numbers<[1], [0], [0], [1], [0, 0, 1, 1], [], []>} : vector<8x128xf32>, vector<128x128xf32>, vector<8x128xf32> -> vector<8x128xf32>
    %c0_9 = arith.constant 0 : index
    %c0_10 = arith.constant 0 : index
    %10 = vector.load %arg5[%c0_9, %c0_10] : memref<1x128xf32, #tpu.memory_space<vmem>>, vector<1x128xf32>
    %11 = vector.broadcast %10 : vector<1x128xf32> to vector<8x128xf32>
    %12 = arith.addf %9, %11 : vector<8x128xf32>
    %cst_11 = arith.constant 0.000000e+00 : f32
    %13 = vector.broadcast %cst_11 : f32 to vector<8x128xf32>
    %14 = arith.maximumf %12, %13 : vector<8x128xf32>
    %c0_12 = arith.constant 0 : index
    %c0_13 = arith.constant 0 : index
    %15 = vector.load %arg6[%c0_12, %c0_13] : memref<128x16xf32, #tpu.memory_space<vmem>>, vector<128x16xf32>
    %cst_14 = arith.constant dense<0.000000e+00> : vector<8x16xf32>
    %16 = tpu.matmul %14, %15, %cst_14 {dimension_numbers = #tpu.dot_dimension_numbers<[1], [0], [0], [1], [0, 0, 1, 1], [], []>} : vector<8x128xf32>, vector<128x16xf32>, vector<8x16xf32> -> vector<8x16xf32>
    %c0_15 = arith.constant 0 : index
    %c0_16 = arith.constant 0 : index
    %17 = vector.load %arg7[%c0_15, %c0_16] : memref<1x16xf32, #tpu.memory_space<vmem>>, vector<1x16xf32>
    %18 = vector.broadcast %17 : vector<1x16xf32> to vector<8x16xf32>
    %19 = arith.addf %16, %18 : vector<8x16xf32>
    %c0_17 = arith.constant 0 : index
    %c0_18 = arith.constant 0 : index
    %20 = vector.load %arg8[%c0_17, %c0_18] : memref<8x16xf32, #tpu.memory_space<vmem>>, vector<8x16xf32>
    tpu.vector_store %arg8[%c0_17, %c0_18], %19 {strides = array<i32>} : memref<8x16xf32, #tpu.memory_space<vmem>>, vector<8x16xf32>,
    return
  }
  func.func @transform_0(%arg0: i32) -> (i32, i32) {
    %c0_i32 = arith.constant 0 : i32
    %c0_i32_0 = arith.constant 0 : i32
    return %arg0, %c0_i32 : i32, i32
  }
  func.func @transform_1(%arg0: i32) -> (i32, i32) {
    %c0_i32 = arith.constant 0 : i32
    %c0_i32_0 = arith.constant 0 : i32
    %c0_i32_1 = arith.constant 0 : i32
    return %c0_i32, %c0_i32_0 : i32, i32
  }
  func.func @transform_2(%arg0: i32) -> (i32, i32) {
    %c0_i32 = arith.constant 0 : i32
    %c0_i32_0 = arith.constant 0 : i32
    %c0_i32_1 = arith.constant 0 : i32
    return %c0_i32, %c0_i32_0 : i32, i32
  }
  func.func @transform_3(%arg0: i32) -> (i32, i32) {
    %c0_i32 = arith.constant 0 : i32
    %c0_i32_0 = arith.constant 0 : i32
    %c0_i32_1 = arith.constant 0 : i32
    return %c0_i32, %c0_i32_0 : i32, i32
  }
  func.func @transform_4(%arg0: i32) -> (i32, i32) {
    %c0_i32 = arith.constant 0 : i32
    %c0_i32_0 = arith.constant 0 : i32
    %c0_i32_1 = arith.constant 0 : i32
    return %c0_i32, %c0_i32_0 : i32, i32
  }
  func.func @transform_5(%arg0: i32) -> (i32, i32) {
    %c0_i32 = arith.constant 0 : i32
    %c0_i32_0 = arith.constant 0 : i32
    %c0_i32_1 = arith.constant 0 : i32
    return %c0_i32, %c0_i32_0 : i32, i32
  }
  func.func @transform_6(%arg0: i32) -> (i32, i32) {
    %c0_i32 = arith.constant 0 : i32
    %c0_i32_0 = arith.constant 0 : i32
    %c0_i32_1 = arith.constant 0 : i32
    return %c0_i32, %c0_i32_0 : i32, i32
  }
  func.func @transform_7(%arg0: i32) -> (i32, i32) {
    %c0_i32 = arith.constant 0 : i32
    %c0_i32_0 = arith.constant 0 : i32
    return %arg0, %c0_i32 : i32, i32
  }
}

</mosaic_0001>

<bundles_post_ra>
// kernel: flame_expression_code_encoder.1
= control target key start
LH: loop header
LB: loop body
LE: loop exit
PB: predicated region body
PF: predicated region fallthrough
CT: control target
= control target key end

     0   :  { %vm43_vm0 = vcmask 1041408   ;;  %s372_s0 = inlined_call_operand.vmem [shape: f32[8,50], index: 0, kind: input, shape index: {}]   ;;  %s373_s1 = inlined_call_operand.vmem [shape: f32[50,128], index: 1, kind: input, shape index: {}]   ;;  %s374_s2 = inlined_call_operand.vmem [shape: f32[1,128], index: 2, kind: input, shape index: {}]   ;;  %s375_s3 = inlined_call_operand.vmem [shape: f32[128,128], index: 3, kind: input, shape index: {}]   ;;  %s376_s4 = inlined_call_operand.vmem [shape: f32[1,128], index: 4, kind: input, shape index: {}]   ;;  %s377_s5 = inlined_call_operand.vmem [shape: f32[128,16], index: 5, kind: input, shape index: {}]   ;;  %s378_s6 = inlined_call_operand.vmem [shape: f32[1,16], index: 6, kind: input, shape index: {}]   ;;  %s379_s7 = inlined_call_operand.hbm [shape: f32[8,16], index: 7, kind: output, shape index: {}]  }
   0x1   :  { %v34_v0 = vld [vmem:[%s373_s1 + $0x30] sm:$0x3]  ;;  %v33_v1 = vld [vmem:[%s373_s1 + $0x28] sm:$0xff]  ;;  %v32_v2 = vld [vmem:[%s373_s1 + $0x20] sm:$0xff] }
   0x2   :  { %167 = vmatpush.msk.msra.mxu0 %vm43_vm0, %v34_v0  ;;  %v83_v3 = vld [vmem:[%s375_s3 + $0x78] sm:$0xff]  ;;  %v82_v4 = vld [vmem:[%s375_s3 + $0x70] sm:$0xff]  ;;  %v81_v6 = vld [vmem:[%s375_s3 + $0x68] sm:$0xff] }
   0x3   :  { %88 = vmatpush.msra.mxu1 %v83_v3  ;;  %v31_v5 = vld [vmem:[%s373_s1 + $0x18] sm:$0xff]  ;;  %v30_v7 = vld [vmem:[%s373_s1 + $0x10] sm:$0xff]  ;;  %v80_v8 = vld [vmem:[%s375_s3 + $0x60] sm:$0xff] }
   0x4   :  { %57 = vmatpush.msra.mxu0 %v33_v1  ;;  %v29_v9 = vld [vmem:[%s373_s1 + $0x8] sm:$0xff]  ;;  %v79_v10 = vld [vmem:[%s375_s3 + $0x58] sm:$0xff] }
   0x5   :  { %89 = vmatpush.msra.mxu1 %v82_v4 }
   0x6   :  { %58 = vmatpush.msra.mxu0 %v32_v2 }
   0x7   :  { %90 = vmatpush.msra.mxu1 %v81_v6 }
   0x8   :  { %59 = vmatpush.msra.mxu0 %v31_v5 }
   0x9   :  { %12 = vsyncpa [#allocation3], 0  ;;  %91 = vmatpush.msra.mxu1 %v80_v8  ;;  %v28_v11 = vld [vmem:[%s373_s1] sm:$0xff]  ;;  %v78_v12 = vld [vmem:[%s375_s3 + $0x50] sm:$0xff]  ;;  %vm39_vm1 = vcmask 408576   ;;  %s199_s10 = smov [#allocation2]  }
   0xa   :  { %60 = vmatpush.msra.mxu0 %v30_v7  ;;  %v27_v13 = vld [vmem:[%s372_s0] sm:$0xff]  ;;  %v77_v14 = vld [vmem:[%s375_s3 + $0x48] sm:$0xff]  ;;  %v75_v16 = vld [vmem:[%s375_s3 + $0x38] sm:$0xff]  ;;  %s156_s0 = sshll.u32 %s199_s10, 4  ;;  %s158_s13 = sshll.u32 %s379_s7, 4  ;;  %vm149_vm2 = vcmask 130048   ;;  %s157_s0 = int_to_ptr.vmem [resolvable:$true] %s156_s0  ;;  %s159_s13 = int_to_ptr.hbm [resolvable:$true] %s158_s13 }
   0xb   :  { %92 = vmatpush.msra.mxu1 %v79_v10  ;;  %v76_v15 = vld [vmem:[%s375_s3 + $0x40] sm:$0xff]  ;;  %v74_v17 = vld [vmem:[%s375_s3 + $0x30] sm:$0xff]  ;;  %v73_v18 = vld [vmem:[%s375_s3 + $0x28] sm:$0xff] }
   0xc   :  { %61 = vmatpush.msra.mxu0 %v29_v9  ;;  %v72_v19 = vld [vmem:[%s375_s3 + $0x20] sm:$0xff]  ;;  %v71_v20 = vld [vmem:[%s375_s3 + $0x18] sm:$0xff]  ;;  %v70_v21 = vld [vmem:[%s375_s3 + $0x10] sm:$0xff] }
   0xd   :  { %93 = vmatpush.msra.mxu1 %v78_v12  ;;  %v69_v22 = vld [vmem:[%s375_s3 + $0x8] sm:$0xff]  ;;  %v68_v23 = vld [vmem:[%s375_s3] sm:$0xff]  ;;  %v124_v24 = vld [vmem:[%s377_s5 + $0x78] sm:$0xff] }
   0xe   :  { %62 = vmatpush.msra.mxu0 %v28_v11  ;;  %v123_v25 = vld [vmem:[%s377_s5 + $0x70] sm:$0xff]  ;;  %129 = vmatpush.msra.mxu2 %v124_v24  ;;  %v122_v26 = vld [vmem:[%s377_s5 + $0x68] sm:$0xff]  ;;  %v121_v27 = vld [vmem:[%s377_s5 + $0x60] sm:$0xff] }
   0xf   :  { %168 = vmatmul.msk.f32.vlgmr.msra.gmra.mxu0 %vm39_vm1, %v27_v13  ;;  %94 = vmatpush.msra.mxu1 %v77_v14  ;;  %v120_v28 = vld [vmem:[%s377_s5 + $0x58] sm:$0xff]  ;;  %v119_v29 = vld [vmem:[%s377_s5 + $0x50] sm:$0xff]  ;;  %v118_v30 = vld [vmem:[%s377_s5 + $0x48] sm:$0xff] }
  0x10   :  { %130 = vmatpush.msra.mxu2 %v123_v25  ;;  %v117_v31 = vld [vmem:[%s377_s5 + $0x40] sm:$0xff]  ;;  %v116_v32 = vld [vmem:[%s377_s5 + $0x38] sm:$0xff]  ;;  %v115_v33 = vld [vmem:[%s377_s5 + $0x30] sm:$0xff] }
  0x11   :  { %95 = vmatpush.msra.mxu1 %v76_v15  ;;  %v114_v34 = vld [vmem:[%s377_s5 + $0x28] sm:$0xff]  ;;  %v113_v35 = vld [vmem:[%s377_s5 + $0x20] sm:$0xff]  ;;  %v112_v36 = vld [vmem:[%s377_s5 + $0x18] sm:$0xff] }
  0x12   :  { %131 = vmatpush.msra.mxu2 %v122_v26  ;;  %v170_v37 = vld [vmem:[%s374_s2] ss:$0 sm:$0xff]  ;;  %v111_v41 = vld [vmem:[%s377_s5 + $0x10] sm:$0xff]  ;;  %v110_v42 = vld [vmem:[%s377_s5 + $0x8] sm:$0xff] }
  0x13   :  { %96 = vmatpush.msra.mxu1 %v75_v16  ;;  %v109_v43 = vld [vmem:[%s377_s5] sm:$0xff] }
  0x14   :  { %132 = vmatpush.msra.mxu2 %v121_v27  ;;  %v171_v44 = vld [vmem:[%s376_s4] ss:$0 sm:$0xff] }
  0x15   :  { %97 = vmatpush.msra.mxu1 %v74_v17  ;;  %v172_v48 = vld [vmem:[%s378_s6] ss:$0 sm:$0xff] }
  0x16   :  { %133 = vmatpush.msra.mxu2 %v120_v28 }
  0x17   :  { %98 = vmatpush.msra.mxu1 %v73_v18 }
  0x18   :  { %134 = vmatpush.msra.mxu2 %v119_v29 }
  0x19   :  { %99 = vmatpush.msra.mxu1 %v72_v19 }
  0x1a   :  { %135 = vmatpush.msra.mxu2 %v118_v30 }
  0x1b   :  { %100 = vmatpush.msra.mxu1 %v71_v20 }
  0x1c   :  { %136 = vmatpush.msra.mxu2 %v117_v31 }
  0x1d   :  { %101 = vmatpush.msra.mxu1 %v70_v21 }
  0x1e   :  { %137 = vmatpush.msra.mxu2 %v116_v32 }
  0x1f   :  { %102 = vmatpush.msra.mxu1 %v69_v22 }
  0x20   :  { %138 = vmatpush.msra.mxu2 %v115_v33 }
  0x21   :  { %103 = vmatpush.msra.mxu1 %v68_v23 }
  0x22   :  { %139 = vmatpush.msra.mxu2 %v114_v34 }
  0x24   :  { %140 = vmatpush.msra.mxu2 %v113_v35 }
  0x26   :  { %141 = vmatpush.msra.mxu2 %v112_v36 }
  0x28   :  { %142 = vmatpush.msra.mxu2 %v111_v41 }
  0x2a   :  { %143 = vmatpush.msra.mxu2 %v110_v42 }
  0x2c   :  { %144 = vmatpush.msra.mxu2 %v109_v43 }
  0x8c   :  { %v64_v38 = vpop.f32.mrf.mxu0 }
  0x8d   :  { %v65_v39 = vadd.f32 %v170_v37, %v64_v38 }
  0x8f   :  { %v67_v40 = vmax.f32 %v65_v39, 0.0 }
  0x91   :  { %104 = vmatmul.f32.vlgmr.msra.gmra.mxu1 %v67_v40 }
 0x10e   :  { %v105_v45 = vpop.f32.mrf.mxu1 }
 0x10f   :  { %v106_v46 = vadd.f32 %v171_v44, %v105_v45 }
 0x111   :  { %v108_v47 = vmax.f32 %v106_v46, 0.0 }
 0x113   :  { %145 = vmatmul.f32.vlgmr.msra.gmra.mxu2 %v108_v47 }
 0x196   :  { %v146_v49 = vpop.f32.mrf.mxu2 }
 0x197   :  { %v147_v50 = vadd.f32 %v172_v48, %v146_v49 }
 0x199   :  { %150 = vst.msk [vmem:[#allocation2] sm:$0xff] %vm149_vm2, %v147_v50 }
 0x19a   :  { %161 = dma.vmem_to_hbm [thread:$0]  %s157_s0, 128, %s159_s13, [#allocation3]  }
 0x19b   :  { %197 = dma.done.wait [#allocation3], 128  }
 0x19c   :  { %198 = vsyncadd [#allocation3], 4294967168 }
 0x19d   :  { %166 = vsyncpa [#allocation3], 1 }

</bundles_post_ra>
